<compile_context>
chip_gen: v7x
topology: tpu7x:2x2x1
jax: 0.10.0
libtpu: 0.0.40
codegen_flags: <defaults>
</compile_context>

<pallas_src>
import functools

import jax
import jax.numpy as jnp
from jax import lax
from jax.experimental import pallas as pl
from jax.experimental.pallas import tpu as pltpu

LANES = 128
SUBLANES = 8
CHUNK = SUBLANES * LANES       # 1024: one (8, 128) f32 vreg tile
MAX_TILE_ROWS = 8192           # (8192, 128) f32 tile = 4 MiB per pipeline buffer


def _exp_loss_partial_kernel(q_ref, s_ref, out_ref, *, beta, block_rows,
                             valid_rows_last, mask_last):
    """Per-lane partial sums of exp(beta*(q - s) + beta) for one tile.

    Writes one (1, 1, 128) lane-partial row per grid step.  Only the last
    block (and only when it is a partial block) pays for a row mask; interior
    blocks take the unmasked fast path.
    """
    q = q_ref[...].astype(jnp.float32)
    s = s_ref[...].astype(jnp.float32)
    b = jnp.float32(beta)
    # beta * (q - s + 1) == beta * (q - s) + beta
    e = jnp.exp(b * (q - s) + b)

    if not mask_last:
        out_ref[...] = jnp.sum(e, axis=0, keepdims=True).reshape(1, 1, LANES)
    else:
        i = pl.program_id(0)
        last = pl.num_programs(0) - 1

        @pl.when(i < last)
        def _():
            out_ref[...] = jnp.sum(e, axis=0, keepdims=True).reshape(1, 1, LANES)

        @pl.when(i == last)
        def _():
            # Rows >= valid_rows_last are block overhang (unspecified VMEM);
            # jnp.where keeps the select NaN-safe for the unselected branch.
            row_ids = lax.broadcasted_iota(jnp.int32, (block_rows, LANES), 0)
            masked = jnp.where(row_ids < valid_rows_last, e, jnp.float32(0.0))
            out_ref[...] = jnp.sum(masked, axis=0, keepdims=True).reshape(
                1, 1, LANES)


def _exp_sum_jnp(q, s, beta):
    b = jnp.float32(beta)
    return jnp.sum(jnp.exp(b * (q.astype(jnp.float32) - s.astype(jnp.float32)) + b))


def exponential_loss(q_values, state_values, beta=0.0002):
    """Pallas implementation of Exponential_loss.forward -> scalar f32."""
    assert q_values.shape == state_values.shape, "shapes must match"
    n = q_values.size  # static Python int
    if n == 0:
        return jnp.float32(jnp.nan)  # mean of empty tensor (matches torch)

    q_flat = q_values.reshape(-1)
    s_flat = state_values.reshape(-1)

    # Kernel handles the 1024-aligned prefix; the ragged tail (< 1024 elems)
    # is summed with plain jnp -> no padded full-array copy, no extra HBM pass.
    n_main = (n // CHUNK) * CHUNK
    total = jnp.float32(0.0)

    if n_main:
        rows = n_main // LANES                       # multiple of 8
        q2d = q_flat[:n_main].reshape(rows, LANES)   # contiguous prefix
        s2d = s_flat[:n_main].reshape(rows, LANES)

        if MAX_TILE_ROWS >= rows >= 2 * SUBLANES:
            # Split into >= 2 blocks so the "parallel" grid axis can feed both
            # TensorCores on v7x (per-block outputs -> no races).
            block_rows = ((rows + 2 * SUBLANES - 1) // (2 * SUBLANES)) * SUBLANES
        else:
            block_rows = min(MAX_TILE_ROWS, rows)
        num_blocks = pl.cdiv(rows, block_rows)
        valid_rows_last = rows - (num_blocks - 1) * block_rows
        mask_last = valid_rows_last != block_rows    # static Python bool

        kernel = functools.partial(
            _exp_loss_partial_kernel, beta=float(beta), block_rows=block_rows,
            valid_rows_last=valid_rows_last, mask_last=mask_last)

        partials = pl.pallas_call(
            kernel,
            out_shape=jax.ShapeDtypeStruct((num_blocks, 1, LANES), jnp.float32),
            grid_spec=pltpu.PrefetchScalarGridSpec(
                num_scalar_prefetch=0,
                grid=(num_blocks,),
                in_specs=[
                    pl.BlockSpec((block_rows, LANES), lambda i: (i, 0)),
                    pl.BlockSpec((block_rows, LANES), lambda i: (i, 0)),
                ],
                # One lane-partial row per grid step -> no loop-carried state,
                # lane-dense unmasked writeback, grid axis safely parallel.
                out_specs=pl.BlockSpec((1, 1, LANES), lambda i: (i, 0, 0)),
            ),
            compiler_params=pltpu.CompilerParams(
                dimension_semantics=("parallel",),
                # 2 inputs x 2 pipeline buffers x 4 MiB = 16 MiB; raise the
                # scoped budget so the largest tile also fits on v5e.
                vmem_limit_bytes=32 * 1024 * 1024),
        )(q2d, s2d)
        total = total + jnp.sum(partials)

    if n_main != n:
        total = total + _exp_sum_jnp(q_flat[n_main:], s_flat[n_main:], beta)

    return total / jnp.float32(n)


def exponential_loss_ref(q_values, state_values, beta=0.0002):
    r = q_values.astype(jnp.float32) - state_values.astype(jnp.float32) + 1.0
    return jnp.mean(jnp.exp(jnp.float32(beta) * r))


if __name__ == "__main__":
    key = jax.random.PRNGKey(0)
    kq, ks, kq2, ks2, kq3, ks3 = jax.random.split(key, 6)

    # Small IQL-like shapes: batch of Q-values and state-values.
    q_shape = (2, 4, 16, 16)  # 2048 elements -> two full (8, 128) row blocks
    q_values = jax.random.normal(kq, q_shape, dtype=jnp.float32) * 3.0
    state_values = jax.random.normal(ks, q_shape, dtype=jnp.float32) * 3.0

    loss = jax.block_until_ready(
        exponential_loss(q_values, state_values, beta=0.0002))
    ref = exponential_loss_ref(q_values, state_values, beta=0.0002)
    assert jnp.allclose(loss, ref, rtol=1e-5, atol=1e-5), (loss, ref)

    # Multi-block grid (megacore split) + ragged (<1024 elem) tail in wrapper.
    n2 = MAX_TILE_ROWS * LANES + 777
    q2 = jax.random.normal(kq2, (n2,), dtype=jnp.float32)
    s2 = jax.random.normal(ks2, (n2,), dtype=jnp.float32)
    loss2 = jax.block_until_ready(exponential_loss(q2, s2))
    ref2 = exponential_loss_ref(q2, s2)
    assert jnp.allclose(loss2, ref2, rtol=1e-4, atol=1e-4), (loss2, ref2)

    # Partial last block (in-kernel row mask path) + ragged tail.
    n3 = 24 * LANES + 100
    q3 = jax.random.normal(kq3, (n3,), dtype=jnp.float32)
    s3 = jax.random.normal(ks3, (n3,), dtype=jnp.float32)
    loss3 = jax.block_until_ready(exponential_loss(q3, s3))
    ref3 = exponential_loss_ref(q3, s3)
    assert jnp.allclose(loss3, ref3, rtol=1e-4, atol=1e-4), (loss3, ref3)

    print("KERNEL_OK")
</pallas_src>

<mosaic_0001>
module attributes {stable_mosaic.version = 11 : i64} {
  func.func @_exp_loss_partial_kernel(%arg0: i32, %arg1: memref<8x128xf32, #tpu.memory_space<vmem>>, %arg2: memref<8x128xf32, #tpu.memory_space<vmem>>, %arg3: memref<1x1x128xf32, #tpu.memory_space<vmem>>) attributes {dimension_semantics = [#tpu.dimension_semantics<parallel>], iteration_bounds = array<i64: 2>, scalar_prefetch = 0 : i64, scratch_operands = 0 : i64, tpu.core_type = #tpu.core_type<tc>, window_params = [{transform_indices = @transform_0, window_bounds = array<i64: 8, 128>}, {transform_indices = @transform_1, window_bounds = array<i64: 8, 128>}, {transform_indices = @transform_2, window_bounds = array<i64: 1, 1, 128>}]} {
    %c0 = arith.constant 0 : index
    %c0_0 = arith.constant 0 : index
    %0 = vector.load %arg1[%c0, %c0_0] : memref<8x128xf32, #tpu.memory_space<vmem>>, vector<8x128xf32>
    %c0_1 = arith.constant 0 : index
    %c0_2 = arith.constant 0 : index
    %1 = vector.load %arg2[%c0_1, %c0_2] : memref<8x128xf32, #tpu.memory_space<vmem>>, vector<8x128xf32>
    %2 = arith.subf %0, %1 : vector<8x128xf32>
    %cst = arith.constant 2.000000e-04 : f32
    %3 = vector.broadcast %cst : f32 to vector<8x128xf32>
    %4 = arith.mulf %3, %2 : vector<8x128xf32>
    %cst_3 = arith.constant 2.000000e-04 : f32
    %5 = vector.broadcast %cst_3 : f32 to vector<8x128xf32>
    %6 = arith.addf %4, %5 : vector<8x128xf32>
    %7 = math.exp %6 : vector<8x128xf32>
    %cst_4 = arith.constant dense<0.000000e+00> : vector<128xf32>
    %8 = vector.multi_reduction <add>, %7, %cst_4 [0] : vector<8x128xf32> to vector<128xf32>
    %9 = vector.shape_cast %8 : vector<128xf32> to vector<1x128xf32>
    %10 = vector.shape_cast %9 : vector<1x128xf32> to vector<1x1x128xf32>
    %c0_5 = arith.constant 0 : index
    %c0_6 = arith.constant 0 : index
    %c0_7 = arith.constant 0 : index
    %11 = vector.load %arg3[%c0_5, %c0_6, %c0_7] : memref<1x1x128xf32, #tpu.memory_space<vmem>>, vector<1x1x128xf32>
    tpu.vector_store %arg3[%c0_5, %c0_6, %c0_7], %10 {strides = array<i32>} : memref<1x1x128xf32, #tpu.memory_space<vmem>>, vector<1x1x128xf32>,
    return
  }
  func.func @transform_0(%arg0: i32) -> (i32, i32) {
    %c0_i32 = arith.constant 0 : i32
    %c0_i32_0 = arith.constant 0 : i32
    return %arg0, %c0_i32 : i32, i32
  }
  func.func @transform_1(%arg0: i32) -> (i32, i32) {
    %c0_i32 = arith.constant 0 : i32
    %c0_i32_0 = arith.constant 0 : i32
    return %arg0, %c0_i32 : i32, i32
  }
  func.func @transform_2(%arg0: i32) -> (i32, i32, i32) {
    %c0_i32 = arith.constant 0 : i32
    %c0_i32_0 = arith.constant 0 : i32
    %c0_i32_1 = arith.constant 0 : i32
    return %arg0, %c0_i32, %c0_i32_0 : i32, i32, i32
  }
}

</mosaic_0001>

<bundles_post_ra>
// kernel: tpu_custom_call.1
= control target key start
LH: loop header
LB: loop body
LE: loop exit
PB: predicated region body
PF: predicated region fallthrough
CT: control target
= control target key end

     0   :  { %7 = vsyncpa [#allocation3], 0  ;;  %s737_s0 = inlined_call_operand.hbm [shape: f32[16,128], index: 0, kind: input, shape index: {}]   ;;  %s738_s1 = inlined_call_operand.hbm [shape: f32[16,128], index: 1, kind: input, shape index: {}]   ;;  %s739_s2 = inlined_call_operand.hbm [shape: f32[2,1,128], index: 2, kind: output, shape index: {}]  }
   0x1   :  { %9 = vsyncpa [#allocation3 + $0x1], 0 }
   0x2   :  { %10 = vsyncpa [#allocation6], 0 }
   0x3   :  { %12 = vsyncpa [#allocation6 + $0x1], 0 }
   0x4   :  { %13 = vsyncpa [#allocation4], 0 }
   0x5   :  { %15 = vsyncpa [#allocation4 + $0x1], 0  ;;  %s527_s9 = smov 0   ;;  %s529_s10 = smov 0  }
   0x6   :  { %s531_s11 = smov 0   ;;  %s533_s12 = smov 0  }
   0x7 LB: > { %s548_s13 = sadd.s32 4294967295, %s507_s12   ;;  %s311_s14 = sadd.s32 4294967294, %s507_s12   ;;  %s507_s12 = sphi %s533_s12, %s758_s12   ;;  %s503_s11 = sphi %s531_s11, %s757_s11   ;;  %s499_s10 = sphi %s529_s10, %s756_s10   ;;  %s495_s9 = sphi %s527_s9, %s755_s9  }
   0x8   : > { %s552_s15 = sadd.s32 1, %s507_s12   ;;  %s28_s16 = sadd.s32 1, %s503_s11 }
   0x9   : > { %s25_s17 = ssub.s32 %s507_s12, %s552_s15  ;;  %p35_p0 = scmp.ne.s32.totalorder %s503_s11, %s499_s10 }
   0xa   : > { %p26_p1 = scmp.eq.s32.totalorder %s25_s17, 0  ;;  %p36_p2 = scmp.eq.s32.totalorder %s507_s12, 0 }
   0xb   : > { %p41_p3 = scmp.ne.s32.totalorder %s499_s10, %s495_s9  ;;  %p42_p4 = scmp.eq.s32.totalorder %s548_s13, 0 }
   0xc   : > { %s564_s18 = scalar_select %p26_p1, %s503_s11, %s28_s16  }
   0xd   : > { %p566_p5 = por %p36_p2, %p35_p0  ;;  %p570_p6 = por %p42_p4, %p41_p3 }
   0xe   : > { %p91_p7 = scmp.eq.s32.totalorder %s548_s13, 1  ;;  %p97_p8 = scmp.eq.s32.totalorder %s311_s14, 1 }
   0xf   : > { %s743_s20 = scalar_select %p570_p6, 1, 0 }
  0x10   : > { %p341_p10 = scmp.lt.s32.totalorder %s507_s12, 2  ;;  %p577_p11 = por %p91_p7, %p35_p0 }
  0x11   : > { %p581_p12 = por %p97_p8, %p41_p3  ;;  %s586_s23 = sand.u32 1, %s503_s11  }
  0x12   : > { %s744_s21 = scalar_select %p577_p11, 1, 0 }
  0x13   : > { %s745_s22 = scalar_select %p581_p12, 1, 0 }
  0x14   : > { %s315_s24 = sshll.u32 %s507_s12, 7  ;;  %s314_s25 = sshll.u32 %s586_s23, 3 }
  0x15   : > { %s595_s28 = scalar_lea.hbm %s737_s0, %s315_s24  ;;  %s121_s29 = scalar_lea.vmem [#allocation2], %s314_s25 }
  0x16   : > { %s128_s30 = sshll.u32 %s121_s29, 4  ;;  %p601_p13 = pnand %p341_p10, %p566_p5  ;;  %s605_s30 = int_to_ptr.vmem [resolvable:$true] %s128_s30 }
  0x17   : > { %s118_s4 = scalar_lea.sflag [#allocation3], %s586_s23  ;;  %s377_s5 = scalar_lea.hbm %s595_s28, 128 }
  0x18   : > { %p378_p2 = scmp.ne.s32.totalorder %s595_s28, %s377_s5  ;;  %p379_p3 = pneg %p601_p13 }
  0x19   : > { %s382_s8 = scalar_lea.hbm %s737_s0, 256  ;;  %p383_p5 = scmp.lt.u32.totalorder %s595_s28, %s737_s0 }
  0x1a   : > { %p380_p4 = pnand %p379_p3, %p378_p2  ;;  %p384_p8 = scmp.lt.u32.totalorder %s382_s8, %s377_s5 }
  0x1b   : > { %p386_p9 = scmp.lt.u32.totalorder %s377_s5, %s595_s28 }
  0x1c   : > { %p381_p7 = pneg %p380_p4  ;;  %p385_p10 = por %p384_p8, %p383_p5 }
  0x1e   : > { %p387_p0 = por %p386_p9, %p385_p10 }
  0x20   : > { %p388_p1 = pnand %p387_p0, %p381_p7 }
  0x22   : > { %391 = shalt.err (!%p388_p1)
}
  0x23   : > { %s392_s17 = scalar_lea.vmem %s605_s30, 128  ;;  %s509_s19 = smov [#allocation2]  }
  0x24   : > { %p393_p2 = scmp.ne.s32.totalorder %s605_s30, %s392_s17  ;;  %s397_s26 = sshll.u32 %s509_s19, 4  ;;  %s398_s26 = int_to_ptr.vmem [resolvable:$false] %s397_s26 }
  0x25   : > { %s399_s27 = scalar_lea.vmem %s398_s26, 256  ;;  %p400_p11 = scmp.lt.s32.totalorder %s605_s30, %s398_s26 }
  0x26   : > { %p395_p4 = pnand %p393_p2, %p379_p3  ;;  %p401_p5 = scmp.lt.s32.totalorder %s399_s27, %s392_s17 }
  0x28   : > { %p396_p12 = pneg %p395_p4  ;;  %p402_p8 = por %p401_p5, %p400_p11 }
  0x2a   : > { %p403_p9 = pnand %p402_p8, %p396_p12 }
  0x2c   : > { %406 = shalt.err (!%p403_p9)
}
  0x2d   : > { %333 = dma.hbm_to_vmem [thread:$0]  (!%p601_p13), %s595_s28, 128, %s605_s30, %s118_s4  }
  0x2e   : > { %p747_p0 = scmp.lt.s32.totalorder %s507_s12, 3  ;;  %p748_p1 = scmp.ge.s32.totalorder %s507_s12, 1 }
  0x2f   : > { %s648_s7 = scalar_lea.hbm %s738_s1, %s315_s24  ;;  %s139_s8 = scalar_lea.vmem [#allocation5], %s314_s25 }
  0x30   : > { %p639_p7 = pnand %p748_p1, %p747_p0  ;;  %s146_s14 = sshll.u32 %s139_s8, 4  ;;  %s147_s14 = int_to_ptr.vmem [resolvable:$true] %s146_s14 }
  0x31   : > { %s136_s28 = scalar_lea.sflag [#allocation6], %s586_s23  ;;  %s407_s30 = scalar_lea.hbm %s648_s7, 128 }
  0x32   : > { %s749_s29 = scalar_select %p639_p7, 1, 0 }
  0x33   : > { %p408_p11 = scmp.ne.s32.totalorder %s648_s7, %s407_s30  ;;  %s412_s24 = scalar_lea.hbm %s738_s1, 256 }
  0x34   : > { %p413_p2 = scmp.lt.u32.totalorder %s648_s7, %s738_s1  ;;  %p414_p4 = scmp.lt.u32.totalorder %s412_s24, %s407_s30 }
  0x35   : > { %p410_p12 = pnand %p408_p11, %p379_p3  ;;  %p416_p8 = scmp.lt.u32.totalorder %s407_s30, %s648_s7 }
  0x36   : > { %p415_p5 = por %p414_p4, %p413_p2 }
  0x37   : > { %p411_p10 = pneg %p410_p12 }
  0x38   : > { %p417_p9 = por %p416_p8, %p415_p5 }
  0x3a   : > { %p418_p0 = pnand %p417_p9, %p411_p10 }
  0x3c   : > { %421 = shalt.err (!%p418_p0)
}
  0x3d   : > { %s422_s23 = scalar_lea.vmem %s147_s14, 128  ;;  %s510_s25 = smov [#allocation5]  }
  0x3e   : > { %p423_p1 = scmp.ne.s32.totalorder %s147_s14, %s422_s23  ;;  %s427_s26 = sshll.u32 %s510_s25, 4  ;;  %s428_s26 = int_to_ptr.vmem [resolvable:$false] %s427_s26 }
  0x3f   : > { %s429_s27 = scalar_lea.vmem %s428_s26, 256  ;;  %p430_p6 = scmp.lt.s32.totalorder %s147_s14, %s428_s26 }
  0x40   : > { %p425_p11 = pnand %p423_p1, %p379_p3  ;;  %p431_p7 = scmp.lt.s32.totalorder %s429_s27, %s422_s23 }
  0x42   : > { %p426_p12 = pneg %p425_p11  ;;  %p432_p2 = por %p431_p7, %p430_p6 }
  0x44   : > { %p433_p4 = pnand %p432_p2, %p426_p12 }
  0x46   : > { %436 = shalt.err (!%p433_p4)
}
  0x47   : > { %336 = dma.hbm_to_vmem [thread:$0]  (!%p601_p13), %s648_s7, 128, %s147_s14, %s136_s28  }
  0x48   : > { %p750_p10 = scmp.ne.s32.totalorder %s749_s29, 0 }
  0x49   : > { %s675_s5 = sand.u32 (!%p750_p10), 1, %s499_s10   ;;  %p751_p3 = scmp.ne.s32.totalorder (!%p750_p10), %s743_s20, 0 }
  0x4a   : > { %155 = sbr.rel (%p750_p10) target bundleno = 130 (0x82), region = 28  ;;  %s319_s6 = sshll.u32 (!%p750_p10), %s675_s5, 3 }
  0x4b   : > { %s158_s8 = scalar_lea.sflag (!%p750_p10), [#allocation3], %s675_s5  ;;  %s161_s30 = scalar_lea.vmem (!%p750_p10), [#allocation2], %s319_s6 }
  0x51   : > { %482 = dma.done.wait (%p751_p3), %s158_s8, 128  }
  0x52   : > { %484 = vsyncadd (%p751_p3), %s158_s8, 4294967168  ;;  %s167_s3 = scalar_lea.sflag [#allocation6], %s675_s5  ;;  %s170_s7 = scalar_lea.vmem [#allocation5], %s319_s6 }
  0x53   : > { %486 = dma.done.wait (%p751_p3), %s167_s3, 128  }
  0x54   : > { %488 = vsyncadd (%p751_p3), %s167_s3, 4294967168  ;;  %v195_v0 = vld [vmem:[%s161_s30] sm:$0xff]  ;;  %v196_v1 = vld [vmem:[%s170_s7] sm:$0xff]  ;;  %s194_s29 = scalar_lea.vmem [#allocation7], %s675_s5  ;;  %s321_s20 = sshll.u32 %s548_s13, 4 }
  0x55   : > { %v197_v2 = vsub.f32 %v195_v0, %v196_v1  ;;  %s222_s14 = sshll.u32 %s194_s29, 4  ;;  %s695_s16 = scalar_lea.hbm %s739_s2, %s321_s20  ;;  %s690_s14 = int_to_ptr.vmem [resolvable:$true] %s222_s14 }
  0x56   : > { %s210_s24 = scalar_lea.sflag [#allocation4], %s675_s5  ;;  %s437_s17 = scalar_lea.vmem %s690_s14, 16 }
  0x57   : > { %v198_v3 = vmul.f32 0.0002, %v197_v2  ;;  %p438_p6 = scmp.ne.s32.totalorder %s690_s14, %s437_s17  ;;  %p752_p13 = scmp.ne.s32.totalorder %s744_s21, 0 }
  0x58   : > { %s511_s13 = smov [#allocation7]  }
  0x59   : > { %v199_v4 = vadd.f32 0.0002, %v198_v3  ;;  %p439_p7 = pnand %p438_p6, %p752_p13  ;;  %s441_s19 = sshll.u32 %s511_s13, 4  ;;  %s442_s19 = int_to_ptr.vmem [resolvable:$false] %s441_s19 }
  0x5a   : > { %s443_s23 = scalar_lea.vmem %s442_s19, 32  ;;  %p444_p8 = scmp.lt.s32.totalorder %s690_s14, %s442_s19 }
  0x5b   : > { %v200_v5 = vmul.f32 1.442695, %v199_v4  ;;  %p440_p5 = pneg %p439_p7  ;;  %p445_p9 = scmp.lt.s32.totalorder %s443_s23, %s437_s17 }
  0x5d   : > { %375 = vpow2.f32 %v200_v5  ;;  %p446_p0 = por %p445_p9, %p444_p8 }
  0x5f   : > { %p447_p1 = pnand %p446_p0, %p440_p5 }
  0x67   : > { %v376_v6 = vpop.eup %375 }
  0x68   : > { %v202_v7 = vrot.slane %v376_v6, 4 }
  0x6a   : > { %v203_v8 = vadd.f32 %v376_v6, %v202_v7 }
  0x6c   : > { %v204_v9 = vrot.slane %v203_v8, 2 }
  0x6e   : > { %v205_v10 = vadd.f32 %v204_v9, %v203_v8 }
  0x70   : > { %v206_v11 = vrot.slane %v205_v10, 1 }
  0x72   : > { %v207_v12 = vadd.f32 %v206_v11, %v205_v10 }
  0x74   : > { %208 = vst [vmem:[%s194_s29] sm:$0x1] %v207_v12 }
  0x75   : > { %450 = shalt.err (!%p447_p1)
}
  0x76   : > { %s451_s25 = scalar_lea.hbm %s695_s16, 16  ;;  %s455_s5 = scalar_lea.hbm %s739_s2, 32 }
  0x77   : > { %p452_p11 = scmp.ne.s32.totalorder %s695_s16, %s451_s25  ;;  %p456_p4 = scmp.lt.u32.totalorder %s695_s16, %s739_s2 }
  0x78   : > { %p457_p10 = scmp.lt.u32.totalorder %s455_s5, %s451_s25  ;;  %p459_p6 = scmp.lt.u32.totalorder %s451_s25, %s695_s16 }
  0x79   : > { %p453_p12 = pnand %p452_p11, %p752_p13 }
  0x7a   : > { %p458_p3 = por %p457_p10, %p456_p4 }
  0x7b   : > { %p454_p2 = pneg %p453_p12 }
  0x7c   : > { %p460_p7 = por %p459_p6, %p458_p3 }
  0x7e   : > { %p461_p5 = pnand %p460_p7, %p454_p2 }
  0x80   : > { %464 = shalt.err (!%p461_p5)
}
  0x81   : > { %328 = dma.vmem_to_hbm [thread:$0]  (%p752_p13), %s690_s14, 16, %s695_s16, %s210_s24  }
  0x82 PF: > { %s234_s30 = sand.u32 1, %s495_s9   ;;  %p753_p8 = scmp.ne.s32.totalorder %s745_s22, 0 }
  0x83   : > { %p754_p9 = scmp.ge.s32.totalorder %s507_s12, 2  ;;  %s235_s3 = scalar_lea.sflag [#allocation4], %s234_s30 }
  0x85   : > { %p338_p0 = pnand %p754_p9, %p753_p8 }
  0x87   : > { %490 = dma.done.wait (!%p338_p0), %s235_s3, 16  }
  0x88   : > { %492 = vsyncadd (!%p338_p0), %s235_s3, 4294967280  ;;  %p18_p1 = scmp.ge.s32.totalorder %s552_s15, 4   ;;  %s755_s9 = smov %s499_s10 }
  0x89   : > { %s756_s10 = smov %s503_s11  ;;  %s757_s11 = smov %s564_s18 }
  0x8a   : > { %s758_s12 = smov %s552_s15  ;;  %20 = sbr.rel (!%p18_p1) target bundleno = 7 (0x7), region = 86 }
  0x91   :  { %239 = vsyncpa [#allocation3], 1 }
  0x92   :  { %241 = vsyncpa [#allocation3 + $0x1], 1 }
  0x93   :  { %242 = vsyncpa [#allocation6], 1 }
  0x94   :  { %244 = vsyncpa [#allocation6 + $0x1], 1 }
  0x95   :  { %245 = vsyncpa [#allocation4], 1 }
  0x96   :  { %247 = vsyncpa [#allocation4 + $0x1], 1 }

</bundles_post_ra>
